<compile_context>
chip_gen: v7x
topology: tpu7x:2x2x1
jax: 0.10.0
libtpu: 0.0.40
codegen_flags: <defaults>
</compile_context>

<pallas_src>
import functools

import jax
import jax.numpy as jnp
from jax.experimental import pallas as pl
from jax.experimental.pallas import tpu as pltpu


def _tclstm_kernel(x_ref, wih_ref, whh_ref, b_ref, wout_ref, bout_ref,
                   out_ref, xproj_scr, *, seq_len, batch, hidden):
    B, H = batch, hidden

    # ---- Hoisted input projection (no recurrent dependency): one big
    #      (T*B, D) x (D, 4H) matmul, (pre-scaled) bias folded in once.
    xproj_scr[...] = (
        jnp.dot(x_ref[...], wih_ref[...], preferred_element_type=jnp.float32)
        + b_ref[...])

    whh = whh_ref[...]                                   # (H, 4H)
    # NOTE: keeping W_hh resident in the MXU across steps via
    # pltpu.matmul_push_rhs / matmul_acc_lhs / matmul_pop is a measure-first
    # follow-up (verify in the bundle dump that Mosaic re-streams the weight
    # tile per step before committing to the low-level MXU path).

    # ---- Recurrent chain: only h @ W_hh per step sits on the serial path.
    def step(t, carry):
        h, c = carry
        idx = pl.multiple_of(t * B, B)
        gates = (xproj_scr[pl.ds(idx, B), :]
                 + jnp.dot(h, whh, preferred_element_type=jnp.float32))  # (B,4H)

        # One EUP tanh over the full (B, 4H) tile.  i/f/o weight columns and
        # bias were pre-scaled by 0.5 so sigmoid(z) == 0.5*tanh(z/2) + 0.5.
        # The sigmoid affine is applied FULL-width before the sub-128-lane
        # gate slicing; g is sliced from the raw tanh.
        tg = jnp.tanh(gates)
        sg = 0.5 * tg + 0.5
        i_g = sg[:, 0 * H:1 * H]
        f_g = sg[:, 1 * H:2 * H]
        g_g = tg[:, 2 * H:3 * H]
        o_g = sg[:, 3 * H:4 * H]

        c_new = f_g * c + i_g * g_g
        h_new = o_g * jnp.tanh(c_new)          # second EUP push of the step
        return (h_new, c_new)

    h0 = jnp.zeros((B, H), jnp.float32)
    c0 = jnp.zeros((B, H), jnp.float32)
    unroll = seq_len if seq_len <= 8 else 8    # cap unroll for long sequences
    h_last, _ = jax.lax.fori_loop(0, seq_len, step, (h0, c0), unroll=unroll)

    # ---- Fused output head on the last hidden state.
    y = (jnp.dot(h_last, wout_ref[...], preferred_element_type=jnp.float32)
         + bout_ref[...])
    out_ref[...] = jax.nn.sigmoid(y).astype(out_ref.dtype)


def prepare_tclstm_params(w_ih, w_hh, b_ih, b_hh, w_out, b_out):
    """ONE-TIME weight preparation (model-init time, NOT per forward call).

    Transposes the PyTorch-layout weights for row-major MXU matmuls and
    pre-scales the i/f/o gate columns (and bias) by 0.5 so the kernel can
    realize the three sigmoids from the single tanh it already needs for g:
        sigmoid(z) = 0.5 * tanh(z/2) + 0.5.
    """
    H = w_hh.shape[1]
    target = w_out.shape[0]
    scale = jnp.concatenate([
        jnp.full((H,), 0.5, jnp.float32),
        jnp.full((H,), 0.5, jnp.float32),
        jnp.ones((H,), jnp.float32),
        jnp.full((H,), 0.5, jnp.float32)])

    wih_t = w_ih.T.astype(jnp.float32) * scale               # (D, 4H)
    whh_t = w_hh.T.astype(jnp.float32) * scale               # (H, 4H)
    b = ((b_ih + b_hh).astype(jnp.float32) * scale).reshape(1, 4 * H)
    wout_t = w_out.T.astype(jnp.float32)                     # (H, target)
    bout = b_out.astype(jnp.float32).reshape(1, target)      # (1, target)
    return wih_t, whh_t, b, wout_t, bout


@jax.jit
def tclstm_forward(x, wih_t, whh_t, b, wout_t, bout):
    """Per-call forward.  x: (T, B, D); weights are the PREPARED tensors from
    prepare_tclstm_params.  Returns (B, target) in f32."""
    T, B, D = x.shape
    H = whh_t.shape[0]
    target = wout_t.shape[1]

    # Reshape is a free layout bitcast for a contiguous f32 x; everything
    # expensive (transposes/scales/bias fold) already happened at init time.
    x2d = x.reshape(T * B, D).astype(jnp.float32)            # (T*B, D)

    kernel = functools.partial(
        _tclstm_kernel, seq_len=T, batch=B, hidden=H)

    vmem = pltpu.MemorySpace.VMEM
    return pl.pallas_call(
        kernel,
        out_shape=jax.ShapeDtypeStruct((B, target), jnp.float32),
        in_specs=[pl.BlockSpec(memory_space=vmem) for _ in range(6)],
        out_specs=pl.BlockSpec(memory_space=vmem),
        scratch_shapes=[pltpu.VMEM((T * B, 4 * H), jnp.float32)],  # x_proj
    )(x2d, wih_t, whh_t, b, wout_t, bout)


def tclstm_reference(x, w_ih, w_hh, b_ih, b_hh, w_out, b_out):
    """Pure-JAX reference of the same forward pass (PyTorch LSTM equations)."""
    T, B, D = x.shape
    H = w_hh.shape[1]
    h0 = jnp.zeros((B, H), jnp.float32)
    c0 = jnp.zeros((B, H), jnp.float32)

    def step(carry, x_t):
        h, c = carry
        gates = x_t @ w_ih.T + b_ih + h @ w_hh.T + b_hh
        i_g = jax.nn.sigmoid(gates[:, 0 * H:1 * H])
        f_g = jax.nn.sigmoid(gates[:, 1 * H:2 * H])
        g_g = jnp.tanh(gates[:, 2 * H:3 * H])
        o_g = jax.nn.sigmoid(gates[:, 3 * H:4 * H])
        c_new = f_g * c + i_g * g_g
        h_new = o_g * jnp.tanh(c_new)
        return (h_new, c_new), h_new

    (h_last, _), _ = jax.lax.scan(step, (h0, c0), x)
    return jax.nn.sigmoid(h_last @ w_out.T + b_out)


if __name__ == "__main__":
    # Small shapes consistent with the module's forward:
    # x: (seq_len, batch, input_dim); hidden_size, target_size from __init__.
    T, B, D, H, TGT = 8, 8, 16, 32, 4

    key = jax.random.PRNGKey(0)
    ks = jax.random.split(key, 7)
    bound = 1.0 / jnp.sqrt(H)

    x = jax.random.normal(ks[0], (T, B, D), jnp.float32)
    w_ih = jax.random.uniform(ks[1], (4 * H, D), jnp.float32, -bound, bound)
    w_hh = jax.random.uniform(ks[2], (4 * H, H), jnp.float32, -bound, bound)
    b_ih = jax.random.uniform(ks[3], (4 * H,), jnp.float32, -bound, bound)
    b_hh = jax.random.uniform(ks[4], (4 * H,), jnp.float32, -bound, bound)
    w_out = jax.random.uniform(ks[5], (TGT, H), jnp.float32, -bound, bound)
    b_out = jax.random.uniform(ks[6], (TGT,), jnp.float32, -bound, bound)

    # One-time weight preparation (out of the per-call path).
    prepared = prepare_tclstm_params(w_ih, w_hh, b_ih, b_hh, w_out, b_out)
    prepared = jax.block_until_ready(prepared)

    y = tclstm_forward(x, *prepared)
    jax.block_until_ready(y)

    y_ref = tclstm_reference(x, w_ih, w_hh, b_ih, b_hh, w_out, b_out)
    assert y.shape == (B, TGT), y.shape
    assert jnp.allclose(y, y_ref, atol=1e-5, rtol=1e-5), (
        float(jnp.max(jnp.abs(y - y_ref))))

    print("KERNEL_OK")
</pallas_src>

<mosaic_0001>
module attributes {stable_mosaic.version = 11 : i64} {
  func.func @_tclstm_kernel(%arg0: memref<64x16xf32, #tpu.memory_space<vmem>>, %arg1: memref<16x128xf32, #tpu.memory_space<vmem>>, %arg2: memref<32x128xf32, #tpu.memory_space<vmem>>, %arg3: memref<1x128xf32, #tpu.memory_space<vmem>>, %arg4: memref<32x4xf32, #tpu.memory_space<vmem>>, %arg5: memref<1x4xf32, #tpu.memory_space<vmem>>, %arg6: memref<8x4xf32, #tpu.memory_space<vmem>>, %arg7: memref<64x128xf32, #tpu.memory_space<vmem>>) attributes {dimension_semantics = [], scalar_prefetch = 0 : i64, scratch_operands = 1 : i64, tpu.core_type = #tpu.core_type<tc>} {
    %c0 = arith.constant 0 : index
    %c0_0 = arith.constant 0 : index
    %0 = vector.load %arg0[%c0, %c0_0] : memref<64x16xf32, #tpu.memory_space<vmem>>, vector<64x16xf32>
    %c0_1 = arith.constant 0 : index
    %c0_2 = arith.constant 0 : index
    %1 = vector.load %arg1[%c0_1, %c0_2] : memref<16x128xf32, #tpu.memory_space<vmem>>, vector<16x128xf32>
    %cst = arith.constant dense<0.000000e+00> : vector<64x128xf32>
    %2 = tpu.matmul %0, %1, %cst {dimension_numbers = #tpu.dot_dimension_numbers<[1], [0], [0], [1], [0, 0, 1, 1], [], []>} : vector<64x16xf32>, vector<16x128xf32>, vector<64x128xf32> -> vector<64x128xf32>
    %c0_3 = arith.constant 0 : index
    %c0_4 = arith.constant 0 : index
    %3 = vector.load %arg3[%c0_3, %c0_4] : memref<1x128xf32, #tpu.memory_space<vmem>>, vector<1x128xf32>
    %4 = vector.broadcast %3 : vector<1x128xf32> to vector<64x128xf32>
    %5 = arith.addf %2, %4 : vector<64x128xf32>
    %c0_5 = arith.constant 0 : index
    %c0_6 = arith.constant 0 : index
    %6 = vector.load %arg7[%c0_5, %c0_6] : memref<64x128xf32, #tpu.memory_space<vmem>>, vector<64x128xf32>
    tpu.vector_store %arg7[%c0_5, %c0_6], %5 {strides = array<i32>} : memref<64x128xf32, #tpu.memory_space<vmem>>, vector<64x128xf32>,
    %c0_7 = arith.constant 0 : index
    %c0_8 = arith.constant 0 : index
    %7 = vector.load %arg2[%c0_7, %c0_8] : memref<32x128xf32, #tpu.memory_space<vmem>>, vector<32x128xf32>
    %cst_9 = arith.constant 0.000000e+00 : f32
    %8 = vector.broadcast %cst_9 : f32 to vector<8x32xf32>
    %cst_10 = arith.constant 0.000000e+00 : f32
    %9 = vector.broadcast %cst_10 : f32 to vector<8x32xf32>
    %c0_i32 = arith.constant 0 : i32
    %c8_i32 = arith.constant 8 : i32
    %10 = arith.muli %c0_i32, %c8_i32 : i32
    %11 = tpu.assume_multiple %10, 8 : i32
    %12 = arith.index_cast %11 : i32 to index
    %c0_11 = arith.constant 0 : index
    %13 = vector.load %arg7[%12, %c0_11] : memref<64x128xf32, #tpu.memory_space<vmem>>, vector<8x128xf32>
    %cst_12 = arith.constant dense<0.000000e+00> : vector<8x128xf32>
    %14 = tpu.matmul %8, %7, %cst_12 {dimension_numbers = #tpu.dot_dimension_numbers<[1], [0], [0], [1], [0, 0, 1, 1], [], []>} : vector<8x32xf32>, vector<32x128xf32>, vector<8x128xf32> -> vector<8x128xf32>
    %15 = arith.addf %13, %14 : vector<8x128xf32>
    %16 = math.tanh %15 : vector<8x128xf32>
    %cst_13 = arith.constant 5.000000e-01 : f32
    %17 = vector.broadcast %cst_13 : f32 to vector<8x128xf32>
    %18 = arith.mulf %17, %16 : vector<8x128xf32>
    %cst_14 = arith.constant 5.000000e-01 : f32
    %19 = vector.broadcast %cst_14 : f32 to vector<8x128xf32>
    %20 = arith.addf %18, %19 : vector<8x128xf32>
    %21 = vector.extract_strided_slice %20 {offsets = [0, 0], sizes = [8, 32], strides = [1, 1]} : vector<8x128xf32> to vector<8x32xf32>
    %22 = vector.extract_strided_slice %20 {offsets = [0, 32], sizes = [8, 32], strides = [1, 1]} : vector<8x128xf32> to vector<8x32xf32>
    %23 = vector.extract_strided_slice %16 {offsets = [0, 64], sizes = [8, 32], strides = [1, 1]} : vector<8x128xf32> to vector<8x32xf32>
    %24 = vector.extract_strided_slice %20 {offsets = [0, 96], sizes = [8, 32], strides = [1, 1]} : vector<8x128xf32> to vector<8x32xf32>
    %25 = arith.mulf %22, %9 : vector<8x32xf32>
    %26 = arith.mulf %21, %23 : vector<8x32xf32>
    %27 = arith.addf %25, %26 : vector<8x32xf32>
    %28 = math.tanh %27 : vector<8x32xf32>
    %29 = arith.mulf %24, %28 : vector<8x32xf32>
    %c1_i32 = arith.constant 1 : i32
    %c8_i32_15 = arith.constant 8 : i32
    %30 = arith.muli %c1_i32, %c8_i32_15 : i32
    %31 = tpu.assume_multiple %30, 8 : i32
    %32 = arith.index_cast %31 : i32 to index
    %c0_16 = arith.constant 0 : index
    %33 = vector.load %arg7[%32, %c0_16] : memref<64x128xf32, #tpu.memory_space<vmem>>, vector<8x128xf32>
    %cst_17 = arith.constant dense<0.000000e+00> : vector<8x128xf32>
    %34 = tpu.matmul %29, %7, %cst_17 {dimension_numbers = #tpu.dot_dimension_numbers<[1], [0], [0], [1], [0, 0, 1, 1], [], []>} : vector<8x32xf32>, vector<32x128xf32>, vector<8x128xf32> -> vector<8x128xf32>
    %35 = arith.addf %33, %34 : vector<8x128xf32>
    %36 = math.tanh %35 : vector<8x128xf32>
    %cst_18 = arith.constant 5.000000e-01 : f32
    %37 = vector.broadcast %cst_18 : f32 to vector<8x128xf32>
    %38 = arith.mulf %37, %36 : vector<8x128xf32>
    %cst_19 = arith.constant 5.000000e-01 : f32
    %39 = vector.broadcast %cst_19 : f32 to vector<8x128xf32>
    %40 = arith.addf %38, %39 : vector<8x128xf32>
    %41 = vector.extract_strided_slice %40 {offsets = [0, 0], sizes = [8, 32], strides = [1, 1]} : vector<8x128xf32> to vector<8x32xf32>
    %42 = vector.extract_strided_slice %40 {offsets = [0, 32], sizes = [8, 32], strides = [1, 1]} : vector<8x128xf32> to vector<8x32xf32>
    %43 = vector.extract_strided_slice %36 {offsets = [0, 64], sizes = [8, 32], strides = [1, 1]} : vector<8x128xf32> to vector<8x32xf32>
    %44 = vector.extract_strided_slice %40 {offsets = [0, 96], sizes = [8, 32], strides = [1, 1]} : vector<8x128xf32> to vector<8x32xf32>
    %45 = arith.mulf %42, %27 : vector<8x32xf32>
    %46 = arith.mulf %41, %43 : vector<8x32xf32>
    %47 = arith.addf %45, %46 : vector<8x32xf32>
    %48 = math.tanh %47 : vector<8x32xf32>
    %49 = arith.mulf %44, %48 : vector<8x32xf32>
    %c2_i32 = arith.constant 2 : i32
    %c8_i32_20 = arith.constant 8 : i32
    %50 = arith.muli %c2_i32, %c8_i32_20 : i32
    %51 = tpu.assume_multiple %50, 8 : i32
    %52 = arith.index_cast %51 : i32 to index
    %c0_21 = arith.constant 0 : index
    %53 = vector.load %arg7[%52, %c0_21] : memref<64x128xf32, #tpu.memory_space<vmem>>, vector<8x128xf32>
    %cst_22 = arith.constant dense<0.000000e+00> : vector<8x128xf32>
    %54 = tpu.matmul %49, %7, %cst_22 {dimension_numbers = #tpu.dot_dimension_numbers<[1], [0], [0], [1], [0, 0, 1, 1], [], []>} : vector<8x32xf32>, vector<32x128xf32>, vector<8x128xf32> -> vector<8x128xf32>
    %55 = arith.addf %53, %54 : vector<8x128xf32>
    %56 = math.tanh %55 : vector<8x128xf32>
    %cst_23 = arith.constant 5.000000e-01 : f32
    %57 = vector.broadcast %cst_23 : f32 to vector<8x128xf32>
    %58 = arith.mulf %57, %56 : vector<8x128xf32>
    %cst_24 = arith.constant 5.000000e-01 : f32
    %59 = vector.broadcast %cst_24 : f32 to vector<8x128xf32>
    %60 = arith.addf %58, %59 : vector<8x128xf32>
    %61 = vector.extract_strided_slice %60 {offsets = [0, 0], sizes = [8, 32], strides = [1, 1]} : vector<8x128xf32> to vector<8x32xf32>
    %62 = vector.extract_strided_slice %60 {offsets = [0, 32], sizes = [8, 32], strides = [1, 1]} : vector<8x128xf32> to vector<8x32xf32>
    %63 = vector.extract_strided_slice %56 {offsets = [0, 64], sizes = [8, 32], strides = [1, 1]} : vector<8x128xf32> to vector<8x32xf32>
    %64 = vector.extract_strided_slice %60 {offsets = [0, 96], sizes = [8, 32], strides = [1, 1]} : vector<8x128xf32> to vector<8x32xf32>
    %65 = arith.mulf %62, %47 : vector<8x32xf32>
    %66 = arith.mulf %61, %63 : vector<8x32xf32>
    %67 = arith.addf %65, %66 : vector<8x32xf32>
    %68 = math.tanh %67 : vector<8x32xf32>
    %69 = arith.mulf %64, %68 : vector<8x32xf32>
    %c3_i32 = arith.constant 3 : i32
    %c8_i32_25 = arith.constant 8 : i32
    %70 = arith.muli %c3_i32, %c8_i32_25 : i32
    %71 = tpu.assume_multiple %70, 8 : i32
    %72 = arith.index_cast %71 : i32 to index
    %c0_26 = arith.constant 0 : index
    %73 = vector.load %arg7[%72, %c0_26] : memref<64x128xf32, #tpu.memory_space<vmem>>, vector<8x128xf32>
    %cst_27 = arith.constant dense<0.000000e+00> : vector<8x128xf32>
    %74 = tpu.matmul %69, %7, %cst_27 {dimension_numbers = #tpu.dot_dimension_numbers<[1], [0], [0], [1], [0, 0, 1, 1], [], []>} : vector<8x32xf32>, vector<32x128xf32>, vector<8x128xf32> -> vector<8x128xf32>
    %75 = arith.addf %73, %74 : vector<8x128xf32>
    %76 = math.tanh %75 : vector<8x128xf32>
    %cst_28 = arith.constant 5.000000e-01 : f32
    %77 = vector.broadcast %cst_28 : f32 to vector<8x128xf32>
    %78 = arith.mulf %77, %76 : vector<8x128xf32>
    %cst_29 = arith.constant 5.000000e-01 : f32
    %79 = vector.broadcast %cst_29 : f32 to vector<8x128xf32>
    %80 = arith.addf %78, %79 : vector<8x128xf32>
    %81 = vector.extract_strided_slice %80 {offsets = [0, 0], sizes = [8, 32], strides = [1, 1]} : vector<8x128xf32> to vector<8x32xf32>
    %82 = vector.extract_strided_slice %80 {offsets = [0, 32], sizes = [8, 32], strides = [1, 1]} : vector<8x128xf32> to vector<8x32xf32>
    %83 = vector.extract_strided_slice %76 {offsets = [0, 64], sizes = [8, 32], strides = [1, 1]} : vector<8x128xf32> to vector<8x32xf32>
    %84 = vector.extract_strided_slice %80 {offsets = [0, 96], sizes = [8, 32], strides = [1, 1]} : vector<8x128xf32> to vector<8x32xf32>
    %85 = arith.mulf %82, %67 : vector<8x32xf32>
    %86 = arith.mulf %81, %83 : vector<8x32xf32>
    %87 = arith.addf %85, %86 : vector<8x32xf32>
    %88 = math.tanh %87 : vector<8x32xf32>
    %89 = arith.mulf %84, %88 : vector<8x32xf32>
    %c4_i32 = arith.constant 4 : i32
    %c8_i32_30 = arith.constant 8 : i32
    %90 = arith.muli %c4_i32, %c8_i32_30 : i32
    %91 = tpu.assume_multiple %90, 8 : i32
    %92 = arith.index_cast %91 : i32 to index
    %c0_31 = arith.constant 0 : index
    %93 = vector.load %arg7[%92, %c0_31] : memref<64x128xf32, #tpu.memory_space<vmem>>, vector<8x128xf32>
    %cst_32 = arith.constant dense<0.000000e+00> : vector<8x128xf32>
    %94 = tpu.matmul %89, %7, %cst_32 {dimension_numbers = #tpu.dot_dimension_numbers<[1], [0], [0], [1], [0, 0, 1, 1], [], []>} : vector<8x32xf32>, vector<32x128xf32>, vector<8x128xf32> -> vector<8x128xf32>
    %95 = arith.addf %93, %94 : vector<8x128xf32>
    %96 = math.tanh %95 : vector<8x128xf32>
    %cst_33 = arith.constant 5.000000e-01 : f32
    %97 = vector.broadcast %cst_33 : f32 to vector<8x128xf32>
    %98 = arith.mulf %97, %96 : vector<8x128xf32>
    %cst_34 = arith.constant 5.000000e-01 : f32
    %99 = vector.broadcast %cst_34 : f32 to vector<8x128xf32>
    %100 = arith.addf %98, %99 : vector<8x128xf32>
    %101 = vector.extract_strided_slice %100 {offsets = [0, 0], sizes = [8, 32], strides = [1, 1]} : vector<8x128xf32> to vector<8x32xf32>
    %102 = vector.extract_strided_slice %100 {offsets = [0, 32], sizes = [8, 32], strides = [1, 1]} : vector<8x128xf32> to vector<8x32xf32>
    %103 = vector.extract_strided_slice %96 {offsets = [0, 64], sizes = [8, 32], strides = [1, 1]} : vector<8x128xf32> to vector<8x32xf32>
    %104 = vector.extract_strided_slice %100 {offsets = [0, 96], sizes = [8, 32], strides = [1, 1]} : vector<8x128xf32> to vector<8x32xf32>
    %105 = arith.mulf %102, %87 : vector<8x32xf32>
    %106 = arith.mulf %101, %103 : vector<8x32xf32>
    %107 = arith.addf %105, %106 : vector<8x32xf32>
    %108 = math.tanh %107 : vector<8x32xf32>
    %109 = arith.mulf %104, %108 : vector<8x32xf32>
    %c5_i32 = arith.constant 5 : i32
    %c8_i32_35 = arith.constant 8 : i32
    %110 = arith.muli %c5_i32, %c8_i32_35 : i32
    %111 = tpu.assume_multiple %110, 8 : i32
    %112 = arith.index_cast %111 : i32 to index
    %c0_36 = arith.constant 0 : index
    %113 = vector.load %arg7[%112, %c0_36] : memref<64x128xf32, #tpu.memory_space<vmem>>, vector<8x128xf32>
    %cst_37 = arith.constant dense<0.000000e+00> : vector<8x128xf32>
    %114 = tpu.matmul %109, %7, %cst_37 {dimension_numbers = #tpu.dot_dimension_numbers<[1], [0], [0], [1], [0, 0, 1, 1], [], []>} : vector<8x32xf32>, vector<32x128xf32>, vector<8x128xf32> -> vector<8x128xf32>
    %115 = arith.addf %113, %114 : vector<8x128xf32>
    %116 = math.tanh %115 : vector<8x128xf32>
    %cst_38 = arith.constant 5.000000e-01 : f32
    %117 = vector.broadcast %cst_38 : f32 to vector<8x128xf32>
    %118 = arith.mulf %117, %116 : vector<8x128xf32>
    %cst_39 = arith.constant 5.000000e-01 : f32
    %119 = vector.broadcast %cst_39 : f32 to vector<8x128xf32>
    %120 = arith.addf %118, %119 : vector<8x128xf32>
    %121 = vector.extract_strided_slice %120 {offsets = [0, 0], sizes = [8, 32], strides = [1, 1]} : vector<8x128xf32> to vector<8x32xf32>
    %122 = vector.extract_strided_slice %120 {offsets = [0, 32], sizes = [8, 32], strides = [1, 1]} : vector<8x128xf32> to vector<8x32xf32>
    %123 = vector.extract_strided_slice %116 {offsets = [0, 64], sizes = [8, 32], strides = [1, 1]} : vector<8x128xf32> to vector<8x32xf32>
    %124 = vector.extract_strided_slice %120 {offsets = [0, 96], sizes = [8, 32], strides = [1, 1]} : vector<8x128xf32> to vector<8x32xf32>
    %125 = arith.mulf %122, %107 : vector<8x32xf32>
    %126 = arith.mulf %121, %123 : vector<8x32xf32>
    %127 = arith.addf %125, %126 : vector<8x32xf32>
    %128 = math.tanh %127 : vector<8x32xf32>
    %129 = arith.mulf %124, %128 : vector<8x32xf32>
    %c6_i32 = arith.constant 6 : i32
    %c8_i32_40 = arith.constant 8 : i32
    %130 = arith.muli %c6_i32, %c8_i32_40 : i32
    %131 = tpu.assume_multiple %130, 8 : i32
    %132 = arith.index_cast %131 : i32 to index
    %c0_41 = arith.constant 0 : index
    %133 = vector.load %arg7[%132, %c0_41] : memref<64x128xf32, #tpu.memory_space<vmem>>, vector<8x128xf32>
    %cst_42 = arith.constant dense<0.000000e+00> : vector<8x128xf32>
    %134 = tpu.matmul %129, %7, %cst_42 {dimension_numbers = #tpu.dot_dimension_numbers<[1], [0], [0], [1], [0, 0, 1, 1], [], []>} : vector<8x32xf32>, vector<32x128xf32>, vector<8x128xf32> -> vector<8x128xf32>
    %135 = arith.addf %133, %134 : vector<8x128xf32>
    %136 = math.tanh %135 : vector<8x128xf32>
    %cst_43 = arith.constant 5.000000e-01 : f32
    %137 = vector.broadcast %cst_43 : f32 to vector<8x128xf32>
    %138 = arith.mulf %137, %136 : vector<8x128xf32>
    %cst_44 = arith.constant 5.000000e-01 : f32
    %139 = vector.broadcast %cst_44 : f32 to vector<8x128xf32>
    %140 = arith.addf %138, %139 : vector<8x128xf32>
    %141 = vector.extract_strided_slice %140 {offsets = [0, 0], sizes = [8, 32], strides = [1, 1]} : vector<8x128xf32> to vector<8x32xf32>
    %142 = vector.extract_strided_slice %140 {offsets = [0, 32], sizes = [8, 32], strides = [1, 1]} : vector<8x128xf32> to vector<8x32xf32>
    %143 = vector.extract_strided_slice %136 {offsets = [0, 64], sizes = [8, 32], strides = [1, 1]} : vector<8x128xf32> to vector<8x32xf32>
    %144 = vector.extract_strided_slice %140 {offsets = [0, 96], sizes = [8, 32], strides = [1, 1]} : vector<8x128xf32> to vector<8x32xf32>
    %145 = arith.mulf %142, %127 : vector<8x32xf32>
    %146 = arith.mulf %141, %143 : vector<8x32xf32>
    %147 = arith.addf %145, %146 : vector<8x32xf32>
    %148 = math.tanh %147 : vector<8x32xf32>
    %149 = arith.mulf %144, %148 : vector<8x32xf32>
    %c7_i32 = arith.constant 7 : i32
    %c8_i32_45 = arith.constant 8 : i32
    %150 = arith.muli %c7_i32, %c8_i32_45 : i32
    %151 = tpu.assume_multiple %150, 8 : i32
    %152 = arith.index_cast %151 : i32 to index
    %c0_46 = arith.constant 0 : index
    %153 = vector.load %arg7[%152, %c0_46] : memref<64x128xf32, #tpu.memory_space<vmem>>, vector<8x128xf32>
    %cst_47 = arith.constant dense<0.000000e+00> : vector<8x128xf32>
    %154 = tpu.matmul %149, %7, %cst_47 {dimension_numbers = #tpu.dot_dimension_numbers<[1], [0], [0], [1], [0, 0, 1, 1], [], []>} : vector<8x32xf32>, vector<32x128xf32>, vector<8x128xf32> -> vector<8x128xf32>
    %155 = arith.addf %153, %154 : vector<8x128xf32>
    %156 = math.tanh %155 : vector<8x128xf32>
    %cst_48 = arith.constant 5.000000e-01 : f32
    %157 = vector.broadcast %cst_48 : f32 to vector<8x128xf32>
    %158 = arith.mulf %157, %156 : vector<8x128xf32>
    %cst_49 = arith.constant 5.000000e-01 : f32
    %159 = vector.broadcast %cst_49 : f32 to vector<8x128xf32>
    %160 = arith.addf %158, %159 : vector<8x128xf32>
    %161 = vector.extract_strided_slice %160 {offsets = [0, 0], sizes = [8, 32], strides = [1, 1]} : vector<8x128xf32> to vector<8x32xf32>
    %162 = vector.extract_strided_slice %160 {offsets = [0, 32], sizes = [8, 32], strides = [1, 1]} : vector<8x128xf32> to vector<8x32xf32>
    %163 = vector.extract_strided_slice %156 {offsets = [0, 64], sizes = [8, 32], strides = [1, 1]} : vector<8x128xf32> to vector<8x32xf32>
    %164 = vector.extract_strided_slice %160 {offsets = [0, 96], sizes = [8, 32], strides = [1, 1]} : vector<8x128xf32> to vector<8x32xf32>
    %165 = arith.mulf %162, %147 : vector<8x32xf32>
    %166 = arith.mulf %161, %163 : vector<8x32xf32>
    %167 = arith.addf %165, %166 : vector<8x32xf32>
    %168 = math.tanh %167 : vector<8x32xf32>
    %169 = arith.mulf %164, %168 : vector<8x32xf32>
    %c8_i32_50 = arith.constant 8 : i32
    %c0_51 = arith.constant 0 : index
    %c0_52 = arith.constant 0 : index
    %170 = vector.load %arg4[%c0_51, %c0_52] : memref<32x4xf32, #tpu.memory_space<vmem>>, vector<32x4xf32>
    %cst_53 = arith.constant dense<0.000000e+00> : vector<8x4xf32>
    %171 = tpu.matmul %169, %170, %cst_53 {dimension_numbers = #tpu.dot_dimension_numbers<[1], [0], [0], [1], [0, 0, 1, 1], [], []>} : vector<8x32xf32>, vector<32x4xf32>, vector<8x4xf32> -> vector<8x4xf32>
    %c0_54 = arith.constant 0 : index
    %c0_55 = arith.constant 0 : index
    %172 = vector.load %arg5[%c0_54, %c0_55] : memref<1x4xf32, #tpu.memory_space<vmem>>, vector<1x4xf32>
    %173 = vector.broadcast %172 : vector<1x4xf32> to vector<8x4xf32>
    %174 = arith.addf %171, %173 : vector<8x4xf32>
    %175 = arith.negf %174 : vector<8x4xf32>
    %176 = math.exp %175 : vector<8x4xf32>
    %cst_56 = arith.constant 1.000000e+00 : f32
    %177 = vector.broadcast %cst_56 : f32 to vector<8x4xf32>
    %178 = arith.addf %177, %176 : vector<8x4xf32>
    %179 = arith.divf %177, %178 : vector<8x4xf32>
    %c0_57 = arith.constant 0 : index
    %c0_58 = arith.constant 0 : index
    %180 = vector.load %arg6[%c0_57, %c0_58] : memref<8x4xf32, #tpu.memory_space<vmem>>, vector<8x4xf32>
    tpu.vector_store %arg6[%c0_57, %c0_58], %179 {strides = array<i32>} : memref<8x4xf32, #tpu.memory_space<vmem>>, vector<8x4xf32>,
    return
  }
}

</mosaic_0001>

<bundles_post_ra>
// kernel: tclstm_forward.1
= control target key start
LH: loop header
LB: loop body
LE: loop exit
PB: predicated region body
PF: predicated region fallthrough
CT: control target
= control target key end

     0   :  { %11 = vsyncpa [#allocation4], 0  ;;  %s1660_s0 = inlined_call_operand.hbm [shape: f32[64,16], index: 0, kind: input, shape index: {}]   ;;  %s1661_s1 = inlined_call_operand.hbm [shape: f32[16,128], index: 1, kind: input, shape index: {}]   ;;  %s1662_s2 = inlined_call_operand.vmem [shape: f32[32,128], index: 2, kind: input, shape index: {}]   ;;  %s1663_s3 = inlined_call_operand.vmem [shape: f32[1,128], index: 3, kind: input, shape index: {}]   ;;  %s1664_s4 = inlined_call_operand.vmem [shape: f32[32,4], index: 4, kind: input, shape index: {}]   ;;  %s1665_s5 = inlined_call_operand.vmem [shape: f32[1,4], index: 5, kind: input, shape index: {}]   ;;  %s1666_s6 = inlined_call_operand.vmem [shape: f32[8,4], index: 6, kind: output, shape index: {}]  }
   0x1   :  { %12 = vsyncpa [#allocation6], 0  ;;  %s1432_s21 = smov [#allocation3]   ;;  %s1384_s25 = scalar_lea.hbm %s1660_s0, 1024 }
   0x2   :  { %s18_s22 = sshll.u32 %s1432_s21, 4  ;;  %p1385_p0 = scmp.ne.s32.totalorder %s1660_s0, %s1384_s25  ;;  %s19_s22 = int_to_ptr.vmem [resolvable:$true] %s18_s22 }
   0x3   :  { %p1388_p1 = scmp.lt.u32.totalorder %s1384_s25, %s1660_s0 }
   0x5   :  { %p1390_p2 = pnand %p1388_p1, %p1385_p0 }
   0x7   :  { %1393 = shalt.err (!%p1390_p2)
}
   0x8   :  { %s1394_s30 = scalar_lea.vmem %s19_s22, 1024  ;;  %p1399_p4 = scmp.lt.s32.totalorder %s19_s22, %s19_s22 }
   0x9   :  { %p1395_p3 = scmp.ne.s32.totalorder %s19_s22, %s1394_s30  ;;  %p1400_p5 = scmp.lt.s32.totalorder %s1394_s30, %s1394_s30 }
   0xb   :  { %p1401_p6 = por %p1400_p5, %p1399_p4 }
   0xd   :  { %p1402_p7 = pnand %p1401_p6, %p1395_p3 }
   0xf   :  { %1405 = shalt.err (!%p1402_p7)
}
  0x10   :  { %s1433_s7 = smov 128   ;;  %s1434_s8 = smov 8  }
  0x11   :  { %24 = dma.hbm_to_vmem [thread:$0]  %s1660_s0, 1024, %s19_s22, [#allocation4], %s1433_s7, %s1433_s7, %s1434_s8  }
  0x12   :  { %s1435_s11 = smov [#allocation5]   ;;  %s1406_s15 = scalar_lea.hbm %s1661_s1, 256 }
  0x13   :  { %s30_s12 = sshll.u32 %s1435_s11, 4  ;;  %p1407_p8 = scmp.ne.s32.totalorder %s1661_s1, %s1406_s15  ;;  %s31_s12 = int_to_ptr.vmem [resolvable:$true] %s30_s12 }
  0x14   :  { %p1410_p9 = scmp.lt.u32.totalorder %s1406_s15, %s1661_s1 }
  0x16   :  { %p1412_p10 = pnand %p1410_p9, %p1407_p8 }
  0x18   :  { %1415 = shalt.err (!%p1412_p10)
}
  0x19   :  { %s1416_s20 = scalar_lea.vmem %s31_s12, 256  ;;  %p1421_p12 = scmp.lt.s32.totalorder %s31_s12, %s31_s12 }
  0x1a   :  { %p1417_p11 = scmp.ne.s32.totalorder %s31_s12, %s1416_s20  ;;  %p1422_p13 = scmp.lt.s32.totalorder %s1416_s20, %s1416_s20 }
  0x1c   :  { %p1423_p0 = por %p1422_p13, %p1421_p12 }
  0x1e   :  { %p1424_p1 = pnand %p1423_p0, %p1417_p11 }
  0x20   :  { %1427 = shalt.err (!%p1424_p1)
}
  0x21   :  { %36 = dma.hbm_to_vmem [thread:$0]  %s1661_s1, 256, %s31_s12, [#allocation6], %s1433_s7, %s1433_s7, %s1434_s8  }
  0x22   :  { %1428 = dma.done.wait [#allocation4], 1024  }
  0x23   :  { %1429 = vsyncadd [#allocation4], 4294966272 }
  0x24   :  { %1430 = dma.done.wait [#allocation6], 256  }
  0x25   :  { %1431 = vsyncadd [#allocation6], 4294967040  ;;  %v1436_v0 = vmov 0.0|0.0   ;;  %vm1437_vm0 = vmmov 0   ;;  %v1438_v1 = vmov 0.0   ;;  %vm68_vm1 = vcmask 130048  }
  0x26   :  { %1285 = vmatprep.subr.bf16.mxu1 %v1436_v0  ;;  %1190 = vmatprep.mubr.msk.f32.mxu1 %vm1437_vm0, %v1438_v1  ;;  %v59_v2 = vld [vmem:[#allocation5] sm:$0xff]  ;;  %v60_v3 = vld [vmem:[#allocation5 + $0x8] sm:$0xff]  ;;  %v208_v9 = vld [vmem:[%s1662_s2 + $0x10] sm:$0xff]  ;;  %s1439_s30 = smov 64   ;;  %s1440_s7 = smov 32   ;;  %vm211_vm2 = vcmask 261120  }
  0x27   :  { %v206_v4 = vld [vmem:[%s1662_s2] sm:$0xff]  ;;  %v1281_v5 = vpack.c.bf16 %v60_v3, %v59_v2  ;;  %v207_v6 = vld [vmem:[%s1662_s2 + $0x8] sm:$0xff]  ;;  %v209_v10 = vld [vmem:[%s1662_s2 + $0x18] sm:$0xff]  ;;  %vm1084_vm3 = vcmask 31744  }
  0x28   :  { %v51_v7 = vld [vmem:[#allocation3] sm:$0xff]  ;;  %v1509_v8 = vpack.c.bf16 %v207_v6, %v206_v4  ;;  %v52_v11 = vld [vmem:[#allocation3 + $0x8] sm:$0xff]  ;;  %v1519_v12 = vpack.c.bf16 %v209_v10, %v208_v9  ;;  %v53_v44 = vld [vmem:[#allocation3 + $0x10] sm:$0xff] }
  0x29   :  { %1170 = vmatprep.mubr.msk.f32.mxu0 %vm68_vm1, %v51_v7  ;;  %1282 = vmatprep.subr.bf16.mxu0 %v1281_v5  ;;  %v1540_v13 = vld [vmem:[%s1663_s3] ss:$0 sm:$0xff]  ;;  %v54_v45 = vld [vmem:[#allocation3 + $0x18] sm:$0xff]  ;;  %v56_v47 = vld [vmem:[#allocation3 + $0x28] sm:$0xff] }
  0x2a   :  { %1287 = vmatpush3.bf16.msra.mxu1 %v1509_v8  ;;  %1284 = vmatpush3.bf16.msra.mxu0 %v1281_v5  ;;  %v55_v46 = vld [vmem:[#allocation3 + $0x20] sm:$0xff]  ;;  %v57_v48 = vld [vmem:[#allocation3 + $0x30] sm:$0xff]  ;;  %v58_v49 = vld [vmem:[#allocation3 + $0x38] sm:$0xff] }
  0x2b   :  { %1288 = vmatprep.subr.bf16.mxu1 %v1436_v0  ;;  %1297 = vmatprep.subr.bf16.mxu0 %v1436_v0 }
  0x2d   :  { %1171 = vmatmul.mubr.msk.f32.vlgmr.msra.gmra.mrb[0].mxu0 %vm68_vm1, %v52_v11 }
  0x2e   :  { %1290 = vmatpush3.bf16.msra.mxu1 %v1519_v12  ;;  %1299 = vmatpush3.bf16.msra.mxu0 %v1509_v8 }
  0x2f   :  { %1291 = vmatprep.subr.bf16.mxu1 %v1436_v0  ;;  %1300 = vmatprep.subr.bf16.mxu0 %v1436_v0 }
  0x30   :  { %1173 = vmatprep.mubr.msk.f32.mxu0 %vm68_vm1, %v53_v44 }
  0x31   :  { %1191 = vmatmul.mubr.f32.vlgmr.msra.gmra.mrb[0].mxu1 %v1438_v1  ;;  %1174 = vmatmul.mubr.msk.f32.gmra.mrb[2].mxu0 %vm68_vm1, %v54_v45 }
  0x32   :  { %1293 = vmatpush3.bf16.msra.mxu1 %v1509_v8  ;;  %1201 = vmatprep.mubr.msk.f32.mxu1 %vm1437_vm0, %v1438_v1 }
  0x33   :  { %1294 = vmatprep.subr.bf16.mxu1 %v1436_v0  ;;  %1302 = vmatpush3.bf16.msra.mxu0 %v1519_v12 }
  0x34   :  { %1309 = vmatprep.subr.bf16.mxu0 %v1436_v0  ;;  %1176 = vmatprep.mubr.msk.f32.mxu0 %vm68_vm1, %v55_v46 }
  0x35   :  { %1177 = vmatmul.mubr.msk.f32.gmra.mrb[4].mxu0 %vm68_vm1, %v56_v47 }
  0x36   :  { %1296 = vmatpush3.bf16.msra.mxu1 %v1519_v12  ;;  %1179 = vmatprep.mubr.msk.f32.mxu0 %vm68_vm1, %v57_v48 }
  0x37   :  { %1303 = vmatprep.subr.bf16.mxu1 %v1436_v0 }
  0x39   :  { %1180 = vmatmul.mubr.msk.f32.gmra.mrb[6].mxu0 %vm68_vm1, %v58_v49 }
  0x3a   :  { %1212 = vmatprep.mubr.msk.f32.mxu0 %vm1437_vm0, %v1438_v1 }
 0x100   :  { %v1172_v14 = vpop.f32.mrb[0].mxu0 }
 0x101   :  { %v159_v15 = vpop.f32.mrb[1].mxu0  ;;  %v165_v32 = vadd.f32 %v1172_v14, %v1540_v13 }
 0x102   :  { %v160_v16 = vadd.f32 %v1540_v13, %v159_v15 }
 0x104   :  { %v281_v17 = vpop.f32.mrb[0].mxu1  ;;  %v1175_v53 = vpop.f32.mrb[2].mxu0 }
 0x105   :  { %v285_v18 = vadd.f32 %v281_v17, %v160_v16  ;;  %v1192_v19 = vpop.f32.mrb[1].mxu1  ;;  %v169_v54 = vpop.f32.mrb[3].mxu0  ;;  %v175_v17 = vadd.f32 %v1175_v53, %v1540_v13 }
 0x106   :  { %v170_v60 = vadd.f32 %v1540_v13, %v169_v54 }
 0x107   :  { %1348 = vtanh.f32 %v285_v18 }
 0x108   :  { %v1567_v55 = vpop.f32.mrb[4].mxu0 }
 0x109   :  { %v1569_v56 = vpop.f32.mrb[5].mxu0  ;;  %v185_v49 = vadd.f32 %v1567_v55, %v1540_v13 }
 0x10c   :  { %v1571_v57 = vpop.f32.mrb[6].mxu0 }
 0x10d   :  { %v1573_v58 = vpop.f32.mrb[7].mxu0 }
 0x111   :  { %v1349_v20 = vpop.eup %1348 }
 0x112   :  { %291 = vrot.lane.b32.xlu0 %v1349_v20, %s1439_s30  ;;  %v287_v21 = vmul.f32 0.5, %v1349_v20 }
 0x114   :  { %v288_v22 = vadd.f32 0.5, %v287_v21 }
 0x116   :  { %v289_v25 = vmul.f32 0.0, %v288_v22 }
 0x184   :  { %v292_v23 = vpop.permute.xlu0 %291 }
 0x185   :  { %v294_v24 = vmul.f32 %v292_v23, %v288_v22 }
 0x187   :  { %296 = vrot.lane.b32.xlu0 %v294_v24, %s1440_s7 }
 0x1f9   :  { %v297_v26 = vpop.permute.xlu0 %296 }
 0x1fa   :  { %v299_v27 = vadd.f32 %v297_v26, %v289_v25 }
 0x1fc   :  { %1350 = vtanh.f32 %v299_v27 }
 0x206   :  { %v1351_v28 = vpop.eup %1350 }
 0x207   :  { %302 = vrot.lane.b32.xlu1 %v1351_v28, %s1439_s30 }
 0x279   :  { %v303_v29 = vpop.permute.xlu1 %302 }
 0x27a   :  { %v305_v30 = vmul.f32 %v303_v29, %v288_v22 }
 0x27c   :  { %309 = vrot.lane.b32.xlu1 %v305_v30, %s1440_s7 }
 0x2ee   :  { %v310_v31 = vpop.permute.xlu1 %309 }
 0x2ef   :  { %1202 = vmatmul.mubr.msk.f32.vlgmr.msra.gmra.mrb[2].mxu1 %vm211_vm2, %v310_v31 }
 0x2f0   :  { %1305 = vmatpush3.bf16.msra.mxu1 %v1509_v8  ;;  %1223 = vmatprep.mubr.msk.f32.mxu1 %vm1437_vm0, %v1438_v1 }
 0x2f1   :  { %1306 = vmatprep.subr.bf16.mxu1 %v1436_v0 }
 0x2f4   :  { %1308 = vmatpush3.bf16.msra.mxu1 %v1519_v12 }
 0x2f5   :  { %1315 = vmatprep.subr.bf16.mxu1 %v1436_v0 }
 0x3c2   :  { %v379_v33 = vpop.f32.mrb[2].mxu1 }
 0x3c3   :  { %v383_v34 = vadd.f32 %v379_v33, %v165_v32  ;;  %v1203_v35 = vpop.f32.mrb[3].mxu1  ;;  %v180_v33 = vadd.f32 %v1540_v13, %v1569_v56 }
 0x3c5   :  { %1352 = vtanh.f32 %v383_v34 }
 0x3cf   :  { %v1353_v36 = vpop.eup %1352 }
 0x3d0   :  { %389 = vrot.lane.b32.xlu0 %v1353_v36, %s1439_s30  ;;  %v385_v37 = vmul.f32 0.5, %v1353_v36 }
 0x3d2   :  { %v386_v38 = vadd.f32 0.5, %v385_v37 }
 0x3d4   :  { %v387_v41 = vmul.f32 %v386_v38, %v299_v27 }
 0x442   :  { %v390_v39 = vpop.permute.xlu0 %389 }
 0x443   :  { %v392_v40 = vmul.f32 %v390_v39, %v386_v38 }
 0x445   :  { %394 = vrot.lane.b32.xlu1 %v392_v40, %s1440_s7 }
 0x4b7   :  { %v395_v42 = vpop.permute.xlu1 %394 }
 0x4b8   :  { %v397_v43 = vadd.f32 %v395_v42, %v387_v41 }
 0x4ba   :  { %1354 = vtanh.f32 %v397_v43 }
 0x4c4   :  { %v1355_v50 = vpop.eup %1354 }
 0x4c5   :  { %400 = vrot.lane.b32.xlu0 %v1355_v50, %s1439_s30 }
 0x537   :  { %v401_v51 = vpop.permute.xlu0 %400 }
 0x538   :  { %v403_v52 = vmul.f32 %v401_v51, %v386_v38 }
 0x53a   :  { %407 = vrot.lane.b32.xlu1 %v403_v52, %s1440_s7 }
 0x5ac   :  { %v408_v59 = vpop.permute.xlu1 %407 }
 0x5ad   :  { %1213 = vmatmul.mubr.msk.f32.vlgmr.msra.gmra.mrb[8].mxu0 %vm211_vm2, %v408_v59 }
 0x5ae   :  { %1311 = vmatpush3.bf16.msra.mxu0 %v1509_v8  ;;  %1234 = vmatprep.mubr.msk.f32.mxu0 %vm1437_vm0, %v1438_v1 }
 0x5af   :  { %1312 = vmatprep.subr.bf16.mxu0 %v1436_v0 }
 0x5b2   :  { %1314 = vmatpush3.bf16.msra.mxu0 %v1519_v12 }
 0x5b3   :  { %1321 = vmatprep.subr.bf16.mxu0 %v1436_v0 }
 0x680   :  { %v477_v61 = vpop.f32.mrb[8].mxu0 }
 0x681   :  { %v481_v62 = vadd.f32 %v477_v61, %v170_v60  ;;  %v1214_v63 = vpop.f32.mrb[9].mxu0 }
 0x683   :  { %1356 = vtanh.f32 %v481_v62 }
 0x68d   :  { %v1357_v2 = vpop.eup %1356 }
 0x68e   :  { %487 = vrot.lane.b32.xlu0 %v1357_v2, %s1439_s30  ;;  %v483_v3 = vmul.f32 0.5, %v1357_v2 }
 0x690   :  { %v484_v4 = vadd.f32 0.5, %v483_v3  ;;  %v190_v3 = vadd.f32 %v1540_v13, %v1573_v58 }
 0x692   :  { %v485_v7 = vmul.f32 %v484_v4, %v397_v43 }
 0x700   :  { %v488_v5 = vpop.permute.xlu0 %487 }
 0x701   :  { %v490_v6 = vmul.f32 %v488_v5, %v484_v4 }
 0x703   :  { %492 = vrot.lane.b32.xlu1 %v490_v6, %s1440_s7 }
 0x775   :  { %v493_v9 = vpop.permute.xlu1 %492 }
 0x776   :  { %v495_v10 = vadd.f32 %v493_v9, %v485_v7 }
 0x778   :  { %1358 = vtanh.f32 %v495_v10 }
 0x782   :  { %v1359_v11 = vpop.eup %1358 }
 0x783   :  { %498 = vrot.lane.b32.xlu0 %v1359_v11, %s1439_s30 }
 0x7f5   :  { %v499_v14 = vpop.permute.xlu0 %498 }
 0x7f6   :  { %v501_v15 = vmul.f32 %v499_v14, %v484_v4 }
 0x7f8   :  { %505 = vrot.lane.b32.xlu1 %v501_v15, %s1440_s7 }
 0x86a   :  { %v506_v16 = vpop.permute.xlu1 %505 }
 0x86b   :  { %1224 = vmatmul.mubr.msk.f32.vlgmr.msra.gmra.mrb[4].mxu1 %vm211_vm2, %v506_v16 }
 0x86c   :  { %1317 = vmatpush3.bf16.msra.mxu1 %v1509_v8  ;;  %1245 = vmatprep.mubr.msk.f32.mxu1 %vm1437_vm0, %v1438_v1 }
 0x86d   :  { %1318 = vmatprep.subr.bf16.mxu1 %v1436_v0 }
 0x870   :  { %1320 = vmatpush3.bf16.msra.mxu1 %v1519_v12 }
 0x871   :  { %1327 = vmatprep.subr.bf16.mxu1 %v1436_v0 }
 0x93e   :  { %v575_v18 = vpop.f32.mrb[4].mxu1 }
 0x93f   :  { %v579_v19 = vadd.f32 %v575_v18, %v175_v17  ;;  %v1225_v20 = vpop.f32.mrb[5].mxu1 }
 0x940   :  { %v195_v20 = vadd.f32 %v1571_v57, %v1540_v13  ;;  %v992_v13 = vld [vmem:[%s1664_s4] sm:$0xff]  ;;  %v993_v57 = vld [vmem:[%s1664_s4 + $0x8] sm:$0xff] }
 0x941   :  { %1360 = vtanh.f32 %v579_v19 }
 0x94b   :  { %v1361_v21 = vpop.eup %1360 }
 0x94c   :  { %585 = vrot.lane.b32.xlu0 %v1361_v21, %s1439_s30  ;;  %v581_v22 = vmul.f32 0.5, %v1361_v21 }
 0x94e   :  { %v582_v23 = vadd.f32 0.5, %v581_v22 }
 0x950   :  { %v583_v26 = vmul.f32 %v582_v23, %v495_v10 }
 0x9be   :  { %v586_v24 = vpop.permute.xlu0 %585 }
 0x9bf   :  { %v588_v25 = vmul.f32 %v586_v24, %v582_v23 }
 0x9c1   :  { %590 = vrot.lane.b32.xlu1 %v588_v25, %s1440_s7 }
 0xa33   :  { %v591_v27 = vpop.permute.xlu1 %590 }
 0xa34   :  { %v593_v28 = vadd.f32 %v591_v27, %v583_v26 }
 0xa36   :  { %1362 = vtanh.f32 %v593_v28 }
 0xa40   :  { %v1363_v29 = vpop.eup %1362 }
 0xa41   :  { %596 = vrot.lane.b32.xlu0 %v1363_v29, %s1439_s30 }
 0xab3   :  { %v597_v30 = vpop.permute.xlu0 %596 }
 0xab4   :  { %v599_v31 = vmul.f32 %v597_v30, %v582_v23 }
 0xab6   :  { %603 = vrot.lane.b32.xlu1 %v599_v31, %s1440_s7 }
 0xb28   :  { %v604_v32 = vpop.permute.xlu1 %603 }
 0xb29   :  { %1235 = vmatmul.mubr.msk.f32.vlgmr.msra.gmra.mrb[10].mxu0 %vm211_vm2, %v604_v32  ;;  %v994_v32 = vld [vmem:[%s1664_s4 + $0x10] sm:$0xff] }
 0xb2a   :  { %1323 = vmatpush3.bf16.msra.mxu0 %v1509_v8  ;;  %1256 = vmatprep.mubr.msk.f32.mxu0 %vm1437_vm0, %v1438_v1 }
 0xb2b   :  { %1324 = vmatprep.subr.bf16.mxu0 %v1436_v0 }
 0xb2e   :  { %1326 = vmatpush3.bf16.msra.mxu0 %v1519_v12 }
 0xb2f   :  { %1333 = vmatprep.subr.bf16.mxu0 %v1436_v0 }
 0xbfc   :  { %v673_v34 = vpop.f32.mrb[10].mxu0 }
 0xbfd   :  { %v677_v35 = vadd.f32 %v673_v34, %v180_v33  ;;  %v1236_v36 = vpop.f32.mrb[11].mxu0  ;;  %v1334_v33 = vpack.c.bf16 %v993_v57, %v992_v13  ;;  %v995_v34 = vld [vmem:[%s1664_s4 + $0x18] sm:$0xff] }
 0xbff   :  { %1364 = vtanh.f32 %v677_v35  ;;  %v1337_v35 = vpack.c.bf16 %v995_v34, %v994_v32 }
 0xc09   :  { %v1365_v37 = vpop.eup %1364 }
 0xc0a   :  { %683 = vrot.lane.b32.xlu0 %v1365_v37, %s1439_s30  ;;  %v679_v38 = vmul.f32 0.5, %v1365_v37 }
 0xc0c   :  { %v680_v39 = vadd.f32 0.5, %v679_v38 }
 0xc0e   :  { %v681_v42 = vmul.f32 %v680_v39, %v593_v28 }
 0xc7c   :  { %v684_v40 = vpop.permute.xlu0 %683 }
 0xc7d   :  { %v686_v41 = vmul.f32 %v684_v40, %v680_v39  ;;  %v1108_v40 = vld [vmem:[%s1665_s5] ss:$0 sm:$0xff] }
 0xc7f   :  { %688 = vrot.lane.b32.xlu1 %v686_v41, %s1440_s7 }
 0xcf1   :  { %v689_v43 = vpop.permute.xlu1 %688 }
 0xcf2   :  { %v691_v44 = vadd.f32 %v689_v43, %v681_v42 }
 0xcf4   :  { %1366 = vtanh.f32 %v691_v44 }
 0xcfe   :  { %v1367_v45 = vpop.eup %1366 }
 0xcff   :  { %694 = vrot.lane.b32.xlu0 %v1367_v45, %s1439_s30 }
 0xd71   :  { %v695_v46 = vpop.permute.xlu0 %694 }
 0xd72   :  { %v697_v47 = vmul.f32 %v695_v46, %v680_v39 }
 0xd74   :  { %701 = vrot.lane.b32.xlu1 %v697_v47, %s1440_s7 }
 0xde6   :  { %v702_v48 = vpop.permute.xlu1 %701 }
 0xde7   :  { %1246 = vmatmul.mubr.msk.f32.vlgmr.msra.gmra.mrb[6].mxu1 %vm211_vm2, %v702_v48 }
 0xde8   :  { %1329 = vmatpush3.bf16.msra.mxu1 %v1509_v8  ;;  %1267 = vmatprep.mubr.msk.f32.mxu1 %vm1437_vm0, %v1438_v1 }
 0xde9   :  { %1330 = vmatprep.subr.bf16.mxu1 %v1436_v0 }
 0xdec   :  { %1332 = vmatpush3.bf16.msra.mxu1 %v1519_v12 }
 0xeba   :  { %v771_v50 = vpop.f32.mrb[6].mxu1 }
 0xebb   :  { %v775_v51 = vadd.f32 %v771_v50, %v185_v49  ;;  %v1247_v52 = vpop.f32.mrb[7].mxu1 }
 0xebd   :  { %1368 = vtanh.f32 %v775_v51 }
 0xec7   :  { %v1369_v53 = vpop.eup %1368 }
 0xec8   :  { %781 = vrot.lane.b32.xlu0 %v1369_v53, %s1439_s30  ;;  %v777_v54 = vmul.f32 0.5, %v1369_v53 }
 0xeca   :  { %v778_v56 = vadd.f32 0.5, %v777_v54 }
 0xecc   :  { %v779_v60 = vmul.f32 %v778_v56, %v691_v44 }
 0xf3a   :  { %v782_v8 = vpop.permute.xlu0 %781 }
 0xf3b   :  { %v784_v59 = vmul.f32 %v782_v8, %v778_v56 }
 0xf3d   :  { %786 = vrot.lane.b32.xlu1 %v784_v59, %s1440_s7 }
 0xfaf   :  { %v787_v61 = vpop.permute.xlu1 %786 }
 0xfb0   :  { %v789_v62 = vadd.f32 %v787_v61, %v779_v60 }
 0xfb2   :  { %1370 = vtanh.f32 %v789_v62 }
 0xfbc   :  { %v1371_v12 = vpop.eup %1370 }
 0xfbd   :  { %792 = vrot.lane.b32.xlu0 %v1371_v12, %s1439_s30 }
0x102f   :  { %v793_v55 = vpop.permute.xlu0 %792 }
0x1030   :  { %v795_v63 = vmul.f32 %v793_v55, %v778_v56 }
0x1032   :  { %799 = vrot.lane.b32.xlu1 %v795_v63, %s1440_s7 }
0x10a4   :  { %v800_v2 = vpop.permute.xlu1 %799 }
0x10a5   :  { %1257 = vmatmul.mubr.msk.f32.vlgmr.msra.gmra.mrb[12].mxu0 %vm211_vm2, %v800_v2 }
0x10a6   :  { %1278 = vmatprep.mubr.msk.f32.mxu0 %vm1437_vm0, %v1438_v1  ;;  %1335 = vmatpush3.bf16.msra.mxu0 %v1334_v33 }
0x10a7   :  { %1336 = vmatprep.subr.bf16.mxu0 %v1436_v0 }
0x10aa   :  { %1338 = vmatpush3.bf16.msra.mxu0 %v1337_v35 }
0x1178   :  { %v869_v4 = vpop.f32.mrb[12].mxu0 }
0x1179   :  { %v873_v5 = vadd.f32 %v869_v4, %v190_v3  ;;  %v1258_v6 = vpop.f32.mrb[13].mxu0 }
0x117b   :  { %1372 = vtanh.f32 %v873_v5 }
0x1185   :  { %v1373_v7 = vpop.eup %1372 }
0x1186   :  { %879 = vrot.lane.b32.xlu0 %v1373_v7, %s1439_s30  ;;  %v875_v9 = vmul.f32 0.5, %v1373_v7 }
0x1188   :  { %v876_v10 = vadd.f32 0.5, %v875_v9 }
0x118a   :  { %v877_v15 = vmul.f32 %v876_v10, %v789_v62 }
0x11f8   :  { %v880_v11 = vpop.permute.xlu0 %879 }
0x11f9   :  { %v882_v14 = vmul.f32 %v880_v11, %v876_v10 }
0x11fb   :  { %884 = vrot.lane.b32.xlu1 %v882_v14, %s1440_s7 }
0x126d   :  { %v885_v16 = vpop.permute.xlu1 %884 }
0x126e   :  { %v887_v17 = vadd.f32 %v885_v16, %v877_v15 }
0x1270   :  { %1374 = vtanh.f32 %v887_v17 }
0x127a   :  { %v1375_v1 = vpop.eup %1374 }
0x127b   :  { %890 = vrot.lane.b32.xlu0 %v1375_v1, %s1439_s30 }
0x12ed   :  { %v891_v58 = vpop.permute.xlu0 %890 }
0x12ee   :  { %v893_v18 = vmul.f32 %v891_v58, %v876_v10 }
0x12f0   :  { %897 = vrot.lane.b32.xlu1 %v893_v18, %s1440_s7 }
0x1362   :  { %v898_v19 = vpop.permute.xlu1 %897 }
0x1363   :  { %1268 = vmatmul.mubr.msk.f32.vlgmr.msra.gmra.mrb[8].mxu1 %vm211_vm2, %v898_v19 }
0x1436   :  { %v967_v21 = vpop.f32.mrb[8].mxu1 }
0x1437   :  { %v971_v22 = vadd.f32 %v967_v21, %v195_v20  ;;  %v1269_v23 = vpop.f32.mrb[9].mxu1 }
0x1439   :  { %1376 = vtanh.f32 %v971_v22 }
0x1443   :  { %v1377_v24 = vpop.eup %1376 }
0x1444   :  { %977 = vrot.lane.b32.xlu0 %v1377_v24, %s1439_s30  ;;  %v973_v25 = vmul.f32 0.5, %v1377_v24 }
0x1446   :  { %v974_v26 = vadd.f32 0.5, %v973_v25 }
0x1448   :  { %v975_v29 = vmul.f32 %v974_v26, %v887_v17 }
0x14b6   :  { %v978_v27 = vpop.permute.xlu0 %977 }
0x14b7   :  { %v980_v28 = vmul.f32 %v978_v27, %v974_v26 }
0x14b9   :  { %982 = vrot.lane.b32.xlu1 %v980_v28, %s1440_s7 }
0x152b   :  { %v983_v30 = vpop.permute.xlu1 %982 }
0x152c   :  { %v985_v31 = vadd.f32 %v983_v30, %v975_v29 }
0x152e   :  { %1378 = vtanh.f32 %v985_v31 }
0x1538   :  { %v1379_v36 = vpop.eup %1378 }
0x1539   :  { %988 = vrot.lane.b32.xlu0 %v1379_v36, %s1439_s30 }
0x15ab   :  { %v989_v37 = vpop.permute.xlu0 %988 }
0x15ac   :  { %v991_v38 = vmul.f32 %v989_v37, %v974_v26 }
0x15ae   :  { %1004 = vrot.lane.b32.xlu1 %v991_v38, %s1440_s7 }
0x1620   :  { %v1005_v39 = vpop.permute.xlu1 %1004 }
0x1621   :  { %1279 = vmatmul.mubr.msk.f32.vlgmr.msra.gmra.mrb[14].mxu0 %vm211_vm2, %v1005_v39 }
0x16f4   :  { %v1074_v41 = vpop.f32.mrb[14].mxu0 }
0x16f5   :  { %v1075_v42 = vadd.f32 %v1108_v40, %v1074_v41  ;;  %v1280_v43 = vpop.f32.mrb[15].mxu0 }
0x16f7   :  { %v1110_v44 = vmul.f32 -1.442695, %v1075_v42 }
0x16f9   :  { %1380 = vpow2.f32 %v1110_v44 }
0x1703   :  { %v1381_v0 = vpop.eup %1380 }
0x1704   :  { %v1081_v45 = vadd.f32 1.0, %v1381_v0 }
0x1706   :  { %1382 = vrcp.f32 %v1081_v45 }
0x1710   :  { %v1383_v46 = vpop.eup %1382 }
0x1711   :  { %1085 = vst.msk [vmem:[%s1666_s6] sm:$0xff] %vm1084_vm3, %v1383_v46 }
0x1712   :  { %1090 = vsyncpa [#allocation4], 1 }
0x1713   :  { %1091 = vsyncpa [#allocation6], 1 }

</bundles_post_ra>
